<compile_context>
chip_gen: v7x
topology: tpu7x:2x2x1
jax: 0.10.0
libtpu: 0.0.40
codegen_flags: <defaults>
</compile_context>

<pallas_src>
import functools

import jax
import jax.numpy as jnp
from jax import lax
from jax.experimental import pallas as pl
from jax.experimental.pallas import tpu as pltpu


def _conv_relu_bn_kernel(x_ref, mask_ref, w_ref, b_ref, g_ref, beta_ref, o_ref, *,
                         C_in, C_out, KH, KW, H_out, Lpad, eps, inv_count):
    # x_ref:    VMEM (C_in, H, Lpad)  -- lane axis = folded (N, W), zero-padded
    # mask_ref: VMEM (1, Lpad) f32    -- 1.0 on valid output lanes, 0.0 on pad
    # w/b/g/beta: SMEM 1-D f32 scalars
    # o_ref:    VMEM (C_out, H_out, Lpad)
    # Hoist the mask broadcast out of the channel loop (no CSE for
    # broadcast_in_dim inside the unrolled loop).
    mask = jnp.broadcast_to(mask_ref[...], (H_out, Lpad))   # (H_out, Lpad)

    for co in range(C_out):
        # Seed the accumulator with the conv bias (one add saved per element).
        acc = jnp.full((H_out, Lpad), b_ref[co], jnp.float32)
        for ci in range(C_in):
            if KW == 1:
                # Static ref slices along sublanes only.
                for kh in range(KH):
                    w = w_ref[(co * C_in + ci) * KH + kh]
                    acc = acc + x_ref[ci, kh:kh + H_out, :] * w
            else:
                # General KW: lane shift via XLU roll; wrapped/contaminated
                # lanes land only on invalid output positions (masked for BN
                # stats and sliced off in the wrapper).
                x_ci = x_ref[ci]                             # (H, Lpad)
                for kw in range(KW):
                    x_s = x_ci if kw == 0 else pltpu.roll(
                        x_ci, shift=(Lpad - kw) % Lpad, axis=-1)
                    for kh in range(KH):
                        w = w_ref[((co * C_in + ci) * KH + kh) * KW + kw]
                        acc = acc + x_s[kh:kh + H_out, :] * w

        # ReLU.
        y = jnp.maximum(acc, 0.0)                            # (H_out, Lpad)

        # BatchNorm2d, training mode: per-channel batch stats over valid
        # (N, H_out, W_out) elements (padded lanes excluded via mask),
        # biased variance (two-pass for numerical safety).
        ym = y * mask
        mean = jnp.sum(ym) * inv_count
        d = (y - mean) * mask
        var = jnp.sum(d * d) * inv_count

        # Fused affine: single mul+add per element.
        scale = g_ref[co] * lax.rsqrt(var + eps)             # EUP rsqrt
        shift = beta_ref[co] - mean * scale
        o_ref[co] = (y * scale + shift).astype(o_ref.dtype)


def conv_layer_forward(x, weight, bias, gamma, beta, *, stride=(1, 1), eps=1e-3):
    """Pallas implementation of ConvLayer.forward. x: (N, C_in, H, W) float32."""
    assert stride == (1, 1)  # TODO(synk): general stride needs strided slicing
    N, C_in, H, W = x.shape
    C_out, C_in_w, KH, KW = weight.shape
    assert C_in_w == C_in
    H_out = H - KH + 1
    W_out = W - KW + 1

    # ---- layout plumbing (lane-dense): fold (N, W) onto the lane axis ----
    L = N * W
    Lpad = max(128, pl.cdiv(L, 128) * 128)
    xf = jnp.transpose(x, (1, 2, 0, 3)).reshape(C_in, H, L).astype(jnp.float32)
    if Lpad != L:
        xf = jnp.pad(xf, ((0, 0), (0, 0), (0, Lpad - L)))

    # Mask of valid output lanes (excludes zero-padding and, for KW > 1, the
    # trailing w positions of each segment).
    l_ids = jnp.arange(Lpad, dtype=jnp.int32)
    valid = (l_ids < L) & ((l_ids % W) < W_out)
    mask = valid.astype(jnp.float32)[None, :]

    inv_count = 1.0 / float(N * H_out * W_out)

    kernel = functools.partial(
        _conv_relu_bn_kernel,
        C_in=C_in, C_out=C_out, KH=KH, KW=KW,
        H_out=H_out, Lpad=Lpad, eps=float(eps), inv_count=inv_count)

    smem = pl.BlockSpec(memory_space=pltpu.MemorySpace.SMEM)
    vmem = pl.BlockSpec(memory_space=pltpu.MemorySpace.VMEM)

    conv_flops = 2 * N * C_out * C_in * KH * KW * H_out * W_out
    bn_flops = 8 * N * C_out * H_out * W_out
    bytes_accessed = (xf.size + Lpad + C_out * H_out * Lpad) * 4 \
        + (weight.size + bias.size + gamma.size + beta.size) * 4

    out = pl.pallas_call(
        kernel,
        out_shape=jax.ShapeDtypeStruct((C_out, H_out, Lpad), jnp.float32),
        in_specs=[vmem, vmem, smem, smem, smem, smem],
        out_specs=vmem,
        cost_estimate=pl.CostEstimate(
            flops=conv_flops + bn_flops,
            transcendentals=C_out,
            bytes_accessed=bytes_accessed),
    )(xf, mask,
      weight.reshape(-1).astype(jnp.float32),
      bias.astype(jnp.float32),
      gamma.astype(jnp.float32),
      beta.astype(jnp.float32))

    # ---- unfold back to NCHW ----
    out = out[:, :, :L].reshape(C_out, H_out, N, W)[..., :W_out]
    return jnp.transpose(out, (2, 0, 1, 3)).astype(x.dtype)


def _reference_forward(x, weight, bias, gamma, beta, eps=1e-3):
    y = lax.conv_general_dilated(
        x, weight, window_strides=(1, 1), padding="VALID",
        dimension_numbers=("NCHW", "OIHW", "NCHW"))
    y = y + bias[None, :, None, None]
    y = jnp.maximum(y, 0.0)
    mean = jnp.mean(y, axis=(0, 2, 3), keepdims=True)
    var = jnp.mean((y - mean) ** 2, axis=(0, 2, 3), keepdims=True)
    return (y - mean) / jnp.sqrt(var + eps) * gamma[None, :, None, None] \
        + beta[None, :, None, None]


def _run_case(key, N, C_in, C_out, H, W, KH, KW):
    k_x, k_w, k_b, k_g, k_bt = jax.random.split(key, 5)
    x = jax.random.normal(k_x, (N, C_in, H, W), jnp.float32)
    weight = jax.random.normal(k_w, (C_out, C_in, KH, KW), jnp.float32) * 0.5
    bias = jax.random.normal(k_b, (C_out,), jnp.float32) * 0.1
    gamma = 1.0 + 0.25 * jax.random.normal(k_g, (C_out,), jnp.float32)
    beta = 0.1 * jax.random.normal(k_bt, (C_out,), jnp.float32)

    out = conv_layer_forward(x, weight, bias, gamma, beta)
    out = jax.block_until_ready(out)

    ref = _reference_forward(x, weight, bias, gamma, beta)
    assert out.shape == (N, C_out, H - KH + 1, W - KW + 1)
    assert jnp.allclose(out, ref, atol=2e-4, rtol=2e-4), "mismatch vs JAX reference"


if __name__ == "__main__":
    key = jax.random.PRNGKey(0)
    k0, k1 = jax.random.split(key)

    # ConvLayer defaults: in_channels=1 -> out_channels=1, kernel (3, 1).
    _run_case(k0, N=2, C_in=1, C_out=1, H=16, W=16, KH=3, KW=1)
    # A slightly wider config (still kernel (3, 1)) to exercise channel loops.
    _run_case(k1, N=2, C_in=2, C_out=3, H=16, W=16, KH=3, KW=1)

    print("KERNEL_OK")
</pallas_src>

<mosaic_0001>
module attributes {stable_mosaic.version = 11 : i64} {
  func.func @_conv_relu_bn_kernel(%arg0: memref<1x16x128xf32, #tpu.memory_space<vmem>>, %arg1: memref<1x128xf32, #tpu.memory_space<vmem>>, %arg2: memref<3xf32, #tpu.memory_space<smem>>, %arg3: memref<1xf32, #tpu.memory_space<smem>>, %arg4: memref<1xf32, #tpu.memory_space<smem>>, %arg5: memref<1xf32, #tpu.memory_space<smem>>, %arg6: memref<1x14x128xf32, #tpu.memory_space<vmem>>) attributes {dimension_semantics = [], scalar_prefetch = 0 : i64, scratch_operands = 0 : i64, tpu.core_type = #tpu.core_type<tc>} {
    %c0 = arith.constant 0 : index
    %c0_0 = arith.constant 0 : index
    %0 = vector.load %arg1[%c0, %c0_0] : memref<1x128xf32, #tpu.memory_space<vmem>>, vector<1x128xf32>
    %1 = vector.shape_cast %0 : vector<1x128xf32> to vector<1x128xf32>
    %2 = vector.broadcast %1 : vector<1x128xf32> to vector<14x128xf32>
    %c0_1 = arith.constant 0 : index
    %3 = memref.load %arg3[%c0_1] : memref<1xf32, #tpu.memory_space<smem>>
    %4 = vector.broadcast %3 : f32 to vector<14x128xf32>
    %c0_2 = arith.constant 0 : index
    %5 = memref.load %arg2[%c0_2] : memref<3xf32, #tpu.memory_space<smem>>
    %c0_3 = arith.constant 0 : index
    %c0_4 = arith.constant 0 : index
    %c0_5 = arith.constant 0 : index
    %6 = vector.load %arg0[%c0_3, %c0_4, %c0_5] : memref<1x16x128xf32, #tpu.memory_space<vmem>>, vector<1x14x128xf32>
    %7 = vector.shape_cast %6 : vector<1x14x128xf32> to vector<14x128xf32>
    %8 = vector.broadcast %5 : f32 to vector<14x128xf32>
    %9 = arith.mulf %7, %8 : vector<14x128xf32>
    %10 = arith.addf %4, %9 : vector<14x128xf32>
    %c1 = arith.constant 1 : index
    %11 = memref.load %arg2[%c1] : memref<3xf32, #tpu.memory_space<smem>>
    %c0_6 = arith.constant 0 : index
    %c1_7 = arith.constant 1 : index
    %c0_8 = arith.constant 0 : index
    %12 = vector.load %arg0[%c0_6, %c1_7, %c0_8] : memref<1x16x128xf32, #tpu.memory_space<vmem>>, vector<1x14x128xf32>
    %13 = vector.shape_cast %12 : vector<1x14x128xf32> to vector<14x128xf32>
    %14 = vector.broadcast %11 : f32 to vector<14x128xf32>
    %15 = arith.mulf %13, %14 : vector<14x128xf32>
    %16 = arith.addf %10, %15 : vector<14x128xf32>
    %c2 = arith.constant 2 : index
    %17 = memref.load %arg2[%c2] : memref<3xf32, #tpu.memory_space<smem>>
    %c0_9 = arith.constant 0 : index
    %c2_10 = arith.constant 2 : index
    %c0_11 = arith.constant 0 : index
    %18 = vector.load %arg0[%c0_9, %c2_10, %c0_11] : memref<1x16x128xf32, #tpu.memory_space<vmem>>, vector<1x14x128xf32>
    %19 = vector.shape_cast %18 : vector<1x14x128xf32> to vector<14x128xf32>
    %20 = vector.broadcast %17 : f32 to vector<14x128xf32>
    %21 = arith.mulf %19, %20 : vector<14x128xf32>
    %22 = arith.addf %16, %21 : vector<14x128xf32>
    %cst = arith.constant 0.000000e+00 : f32
    %23 = vector.broadcast %cst : f32 to vector<14x128xf32>
    %24 = arith.maximumf %22, %23 : vector<14x128xf32>
    %25 = arith.mulf %24, %2 : vector<14x128xf32>
    %26 = vector.shape_cast %25 : vector<14x128xf32> to vector<1x14x128xf32>
    %cst_12 = arith.constant dense<0.000000e+00> : vector<1xf32>
    %27 = vector.multi_reduction <add>, %26, %cst_12 [1, 2] : vector<1x14x128xf32> to vector<1xf32>
    %28 = vector.shape_cast %27 : vector<1xf32> to vector<1x1x1xf32>
    %29 = vector.extract %28[0, 0, 0] : f32 from vector<1x1x1xf32>
    %cst_13 = arith.constant 0.00223214296 : f32
    %30 = arith.mulf %29, %cst_13 : f32
    %31 = vector.broadcast %30 : f32 to vector<14x128xf32>
    %32 = arith.subf %24, %31 : vector<14x128xf32>
    %33 = arith.mulf %32, %2 : vector<14x128xf32>
    %34 = arith.mulf %33, %33 : vector<14x128xf32>
    %35 = vector.shape_cast %34 : vector<14x128xf32> to vector<1x14x128xf32>
    %cst_14 = arith.constant dense<0.000000e+00> : vector<1xf32>
    %36 = vector.multi_reduction <add>, %35, %cst_14 [1, 2] : vector<1x14x128xf32> to vector<1xf32>
    %37 = vector.shape_cast %36 : vector<1xf32> to vector<1x1x1xf32>
    %38 = vector.extract %37[0, 0, 0] : f32 from vector<1x1x1xf32>
    %cst_15 = arith.constant 0.00223214296 : f32
    %39 = arith.mulf %38, %cst_15 : f32
    %c0_16 = arith.constant 0 : index
    %40 = memref.load %arg4[%c0_16] : memref<1xf32, #tpu.memory_space<smem>>
    %cst_17 = arith.constant 1.000000e-03 : f32
    %41 = arith.addf %39, %cst_17 : f32
    %42 = math.rsqrt %41 : f32
    %43 = arith.mulf %40, %42 : f32
    %c0_18 = arith.constant 0 : index
    %44 = memref.load %arg5[%c0_18] : memref<1xf32, #tpu.memory_space<smem>>
    %45 = arith.mulf %30, %43 : f32
    %46 = arith.subf %44, %45 : f32
    %47 = vector.broadcast %43 : f32 to vector<14x128xf32>
    %48 = arith.mulf %24, %47 : vector<14x128xf32>
    %49 = vector.broadcast %46 : f32 to vector<14x128xf32>
    %50 = arith.addf %48, %49 : vector<14x128xf32>
    %c0_19 = arith.constant 0 : index
    %c0_20 = arith.constant 0 : index
    %c0_21 = arith.constant 0 : index
    %51 = vector.load %arg6[%c0_19, %c0_20, %c0_21] : memref<1x14x128xf32, #tpu.memory_space<vmem>>, vector<1x14x128xf32>
    %52 = vector.shape_cast %51 : vector<1x14x128xf32> to vector<14x128xf32>
    %53 = vector.shape_cast %50 : vector<14x128xf32> to vector<1x14x128xf32>
    tpu.vector_store %arg6[%c0_19, %c0_20, %c0_21], %53 {strides = array<i32>} : memref<1x14x128xf32, #tpu.memory_space<vmem>>, vector<1x14x128xf32>,
    return
  }
}

</mosaic_0001>

<bundles_post_ra>
// kernel: tpu_custom_call.1
= control target key start
LH: loop header
LB: loop body
LE: loop exit
PB: predicated region body
PF: predicated region fallthrough
CT: control target
= control target key end

     0   :  { %14 = vsyncpa [#allocation6], 0  ;;  %s275_s0 = inlined_call_operand.hbm [shape: f32[1,16,128], index: 0, kind: input, shape index: {}]   ;;  %s276_s1 = inlined_call_operand.vmem [shape: f32[1,128], index: 1, kind: input, shape index: {}]   ;;  %s277_s2 = inlined_call_operand.vmem [shape: f32[3], index: 2, kind: input, shape index: {}]   ;;  %s278_s3 = inlined_call_operand.<no memory space> [shape: f32[1], index: 3, kind: input, shape index: {}]   ;;  %s279_s4 = inlined_call_operand.<no memory space> [shape: f32[1], index: 4, kind: input, shape index: {}]   ;;  %s280_s5 = inlined_call_operand.<no memory space> [shape: f32[1], index: 5, kind: input, shape index: {}]   ;;  %s281_s6 = inlined_call_operand.vmem [shape: f32[1,14,128], index: 6, kind: output, shape index: {}]  }
   0x1   :  { %15 = vsyncpa [#allocation7], 0  ;;  %s198_s21 = smov [#allocation5]   ;;  %s36_s25 = sshll.u32 %s277_s2, 4  ;;  %s37_s25 = int_to_ptr.vmem [resolvable:$true] %s36_s25 }
   0x2   :  { %s21_s22 = sshll.u32 %s198_s21, 4  ;;  %s160_s28 = scalar_lea.hbm %s275_s0, 256  ;;  %s22_s22 = int_to_ptr.vmem [resolvable:$true] %s21_s22 }
   0x3   :  { %p161_p0 = scmp.ne.s32.totalorder %s275_s0, %s160_s28  ;;  %p164_p1 = scmp.lt.u32.totalorder %s160_s28, %s275_s0 }
   0x5   :  { %p166_p2 = pnand %p164_p1, %p161_p0 }
   0x7   :  { %169 = shalt.err (!%p166_p2)
}
   0x8   :  { %s170_s9 = scalar_lea.vmem %s22_s22, 256  ;;  %p175_p4 = scmp.lt.s32.totalorder %s22_s22, %s22_s22 }
   0x9   :  { %p171_p3 = scmp.ne.s32.totalorder %s22_s22, %s170_s9  ;;  %p176_p5 = scmp.lt.s32.totalorder %s170_s9, %s170_s9 }
   0xb   :  { %p177_p6 = por %p176_p5, %p175_p4 }
   0xd   :  { %p178_p7 = pnand %p177_p6, %p171_p3 }
   0xf   :  { %181 = shalt.err (!%p178_p7)
}
  0x10   :  { %s199_s2 = smov 128   ;;  %s200_s10 = smov 8  }
  0x11   :  { %27 = dma.hbm_to_vmem [thread:$0]  %s275_s0, 256, %s22_s22, [#allocation6], %s199_s2, %s199_s2, %s200_s10  }
  0x12   :  { %s182_s13 = scalar_lea.vmem %s37_s25, 16  ;;  %p187_p9 = scmp.lt.s32.totalorder %s37_s25, %s37_s25 }
  0x13   :  { %p183_p8 = scmp.ne.s32.totalorder %s37_s25, %s182_s13  ;;  %p188_p10 = scmp.lt.s32.totalorder %s182_s13, %s182_s13 }
  0x15   :  { %p189_p11 = por %p188_p10, %p187_p9 }
  0x17   :  { %p190_p12 = pnand %p189_p11, %p183_p8 }
  0x19   :  { %193 = shalt.err (!%p190_p12)
}
  0x1a   :  { %s201_s14 = smov [#allocation8]  }
  0x1b   :  { %39 = dma.vmem_to_smem %s37_s25, 16, %s201_s14, [#allocation7]  }
  0x1c   :  { %194 = dma.done.wait [#allocation6], 256  }
  0x1d   :  { %195 = vsyncadd [#allocation6], 4294967040 }
  0x1e   :  { %196 = dma.done.wait [#allocation7], 16  }
  0x1f   :  { %197 = vsyncadd [#allocation7], 4294967280 }
  0x20   :  { %52 = sfence }
  0x21   :  { %s62_s15 = sld [smem:[#allocation8]]  ;;  %s146_s16 = sld [smem:[#allocation8 + $0x1]]  ;;  %v63_v0 = vld [vmem:[#allocation5] sm:$0xff]  ;;  %v64_v1 = vld [vmem:[#allocation5 + $0x8] sm:$0x3f]  ;;  %v61_v4 = vstv %s278_s3  ;;  %vm90_vm0 = vcmask 1045504  }
  0x22   :  { %s147_s17 = sld [smem:[#allocation8 + $0x2]]  ;;  %v71_v2 = vld [vmem:[#allocation5 + $0x1] sm:$0xff]  ;;  %v72_v3 = vld [vmem:[#allocation5 + $0x9] sm:$0x3f]  ;;  %v145_v22 = vld [vmem:[%s276_s1] ss:$0 sm:$0xff] }
  0x23   :  { %v79_v6 = vld [vmem:[#allocation5 + $0x2] sm:$0xff]  ;;  %v80_v7 = vld [vmem:[#allocation5 + $0xa] sm:$0x3f] }
  0x27   :  { %v65_v5 = vstv %s62_s15  ;;  %v73_v10 = vstv %s146_s16 }
  0x28   :  { %v66_v8 = vmul.f32 %v65_v5, %v63_v0  ;;  %v67_v9 = vmul.f32 %v65_v5, %v64_v1  ;;  %v74_v11 = vmul.f32 %v73_v10, %v71_v2  ;;  %v75_v12 = vmul.f32 %v73_v10, %v72_v3 }
  0x29   :  { %v81_v13 = vstv %s147_s17 }
  0x2a   :  { %v68_v14 = vadd.f32 %v66_v8, %v61_v4  ;;  %v69_v15 = vadd.f32 %v67_v9, %v61_v4  ;;  %v82_v16 = vmul.f32 %v81_v13, %v79_v6  ;;  %v83_v17 = vmul.f32 %v81_v13, %v80_v7 }
  0x2c   :  { %v76_v18 = vadd.f32 %v74_v11, %v68_v14  ;;  %v77_v19 = vadd.f32 %v75_v12, %v69_v15 }
  0x2e   :  { %v84_v20 = vadd.f32 %v82_v16, %v76_v18  ;;  %v85_v21 = vadd.f32 %v83_v17, %v77_v19 }
  0x30   :  { %v86_v23 = vmax.f32 %v84_v20, 0.0  ;;  %v87_v24 = vmax.f32 %v85_v21, 0.0 }
  0x32   :  { %v88_v25 = vmul.f32 %v145_v22, %v86_v23  ;;  %v89_v26 = vmul.f32 %v145_v22, %v87_v24 }
  0x34   :  { %v91_v27 = vsel %vm90_vm0, %v89_v26, 0.0 }
  0x35   :  { %v92_v28 = vadd.f32 %v91_v27, %v88_v25 }
  0x37   :  { %93 = vadd.xlane.f32.xlu0 %v92_v28 }
  0xc4   :  { %v94_v29 = vpop.xlane.xlu0 %93 }
  0xc5   :  { %v95_v30 = vrot.slane %v94_v29, 4 }
  0xc7   :  { %v96_v31 = vadd.f32 %v95_v30, %v94_v29 }
  0xc9   :  { %v97_v32 = vrot.slane %v96_v31, 2 }
  0xcb   :  { %v98_v33 = vadd.f32 %v97_v32, %v96_v31 }
  0xcd   :  { %v99_v34 = vrot.slane %v98_v33, 1 }
  0xcf   :  { %v100_v35 = vadd.f32 %v99_v34, %v98_v33 }
  0xd1   :  { %148 = vpush %v100_v35 }
 0x102   :  { %s259_s3 = spop %148 }
 0x103   :  { %s102_s1 = smul.f32 0.002232143, %s259_s3 }
 0x105   :  { %v103_v36 = vstv %s102_s1 }
 0x106   :  { %v104_v37 = vsub.f32 %v86_v23, %v103_v36  ;;  %v105_v38 = vsub.f32 %v87_v24, %v103_v36 }
 0x108   :  { %v106_v39 = vmul.f32 %v145_v22, %v104_v37  ;;  %v107_v40 = vmul.f32 %v145_v22, %v105_v38 }
 0x10a   :  { %v108_v41 = vmul.f32 %v106_v39, %v106_v39  ;;  %v109_v42 = vmul.f32 %v107_v40, %v107_v40 }
 0x10c   :  { %v110_v43 = vsel %vm90_vm0, %v109_v42, 0.0 }
 0x10d   :  { %v111_v44 = vadd.f32 %v110_v43, %v108_v41 }
 0x10f   :  { %112 = vadd.xlane.f32.xlu0 %v111_v44 }
 0x19c   :  { %v113_v45 = vpop.xlane.xlu0 %112 }
 0x19d   :  { %v114_v46 = vrot.slane %v113_v45, 4 }
 0x19f   :  { %v115_v47 = vadd.f32 %v114_v46, %v113_v45 }
 0x1a1   :  { %v116_v48 = vrot.slane %v115_v47, 2 }
 0x1a3   :  { %v117_v49 = vadd.f32 %v116_v48, %v115_v47 }
 0x1a5   :  { %v118_v50 = vrot.slane %v117_v49, 1 }
 0x1a7   :  { %v119_v51 = vadd.f32 %v118_v50, %v117_v49 }
 0x1a9   :  { %150 = vpush %v119_v51 }
 0x1da   :  { %s151_s21 = spop %150 }
 0x1db   :  { %s121_s22 = smul.f32 0.002232143, %s151_s21 }
 0x1dd   :  { %s123_s23 = sadd.f32 0.001, %s121_s22 }
 0x1df   :  { %v124_v52 = vstv %s123_s23 }
 0x1e0   :  { %158 = vrsqrt.f32 %v124_v52 }
 0x1ea   :  { %v159_v53 = vpop.eup %158 }
 0x1eb   :  { %152 = vpush %v159_v53 }
 0x21c   :  { %s153_s24 = spop %152 }
 0x21d   :  { %s127_s27 = smul.f32 %s153_s24, %s279_s4 }
 0x21f   :  { %s129_s28 = smul.f32 %s127_s27, %s102_s1  ;;  %v131_v54 = vstv %s127_s27 }
 0x220   :  { %v132_v55 = vmul.f32 %v131_v54, %v86_v23  ;;  %v133_v56 = vmul.f32 %v131_v54, %v87_v24 }
 0x221   :  { %s130_s7 = ssub.f32 %s280_s5, %s129_s28 }
 0x223   :  { %v134_v57 = vstv %s130_s7 }
 0x224   :  { %v135_v58 = vadd.f32 %v134_v57, %v132_v55  ;;  %v136_v59 = vadd.f32 %v134_v57, %v133_v56 }
 0x226   :  { %137 = vst [vmem:[%s281_s6] sm:$0xff] %v135_v58  ;;  %138 = vst [vmem:[%s281_s6 + $0x8] sm:$0x3f] %v136_v59 }
 0x227   :  { %143 = vsyncpa [#allocation6], 1 }
 0x228   :  { %144 = vsyncpa [#allocation7], 1 }

</bundles_post_ra>
